<compile_context>
chip_gen: v6e
topology: v6e:2x2x1
jax: 0.10.0
libtpu: 0.0.40
codegen_flags: <defaults>
</compile_context>

<pallas_src>
import functools
import math

import jax
import jax.numpy as jnp
from jax.experimental import pallas as pl
from jax.experimental.pallas import tpu as pltpu


def gcn_kernel(x_ref, w_ref, a_ref, b_ref, o_ref, *, batch, n_nodes, f_in, f_out):
    """Fused GCN layer, single grid step, f32 end-to-end.

    x_ref: (B, N, F_in)  f32
    w_ref: (F_in, F_out) f32
    a_ref: (N, N)        f32
    b_ref: (1, F_out)    f32
    o_ref: (B, N, F_out) f32
    """
    hp = jax.lax.Precision.HIGHEST

    # Feature transform for ALL batches at once: fold batch into the sublane
    # (row) axis -> one MXU matmul instead of B slivers.
    x2d = x_ref[...].reshape(batch * n_nodes, f_in)
    support = jnp.dot(x2d, w_ref[...],
                      preferred_element_type=jnp.float32, precision=hp)

    # Lane-concatenate the per-batch support slices -> (N, B*F_out) so the
    # neighborhood aggregation is a single MXU matmul (adjmat broadcast over
    # batch, as in torch.matmul).
    sup_cat = jnp.concatenate(
        [support[b * n_nodes:(b + 1) * n_nodes, :] for b in range(batch)],
        axis=1)
    agg = jnp.dot(a_ref[...], sup_cat,
                  preferred_element_type=jnp.float32, precision=hp)

    # Bias added once to the concatenated result (hoisted out of any loop).
    bias = b_ref[...]                                   # (1, F_out)
    bias_cat = jnp.concatenate([bias] * batch, axis=1)  # (1, B*F_out)
    agg = agg + bias_cat

    # Split back per batch for the stores.
    for b in range(batch):
        o_ref[b, :, :] = agg[:, b * f_out:(b + 1) * f_out].astype(o_ref.dtype)


def graph_convolution(x, weight, adjmat, bias=None):
    """x: [B, N, F_in], weight: [F_in, F_out], adjmat: [N, N], bias: [F_out] or None."""
    B, N, F_in = x.shape
    F_out = weight.shape[1]
    out_dtype = x.dtype

    if bias is None:
        bias2d = jnp.zeros((1, F_out), jnp.float32)
    else:
        bias2d = bias.astype(jnp.float32).reshape(1, F_out)

    flops = 2 * B * N * F_in * F_out + 2 * B * N * N * F_out
    bytes_accessed = 4 * (x.size + weight.size + adjmat.size
                          + bias2d.size + B * N * F_out)

    out = pl.pallas_call(
        functools.partial(gcn_kernel, batch=B, n_nodes=N, f_in=F_in, f_out=F_out),
        out_shape=jax.ShapeDtypeStruct((B, N, F_out), out_dtype),
        grid=(1,),
        in_specs=[
            # Full-array blocks: no padding, no extra wrapper-side HLO ops.
            pl.BlockSpec((B, N, F_in), lambda i: (0, 0, 0)),
            pl.BlockSpec((F_in, F_out), lambda i: (0, 0)),
            pl.BlockSpec((N, N), lambda i: (0, 0)),
            pl.BlockSpec((1, F_out), lambda i: (0, 0)),
        ],
        out_specs=pl.BlockSpec((B, N, F_out), lambda i: (0, 0, 0)),
        compiler_params=pltpu.CompilerParams(
            dimension_semantics=("arbitrary",),
            vmem_limit_bytes=4 * 1024 * 1024,
        ),
        cost_estimate=pl.CostEstimate(
            flops=flops, transcendentals=0, bytes_accessed=bytes_accessed),
    )(x.astype(jnp.float32), weight.astype(jnp.float32),
      adjmat.astype(jnp.float32), bias2d)

    return out


if __name__ == "__main__":
    # Small shapes consistent with the module: batch=2, N=64 nodes,
    # in_features=32, out_features=32.
    B, N, F_in, F_out = 2, 64, 32, 32

    key = jax.random.PRNGKey(0)
    kx, kw, kb, ka = jax.random.split(key, 4)

    # Deterministic parameter init mirroring reset_parameters():
    # uniform(-stdv, stdv) with stdv = 6 / sqrt(F_in + F_out)
    stdv = 6.0 / math.sqrt(F_in + F_out)
    weight = jax.random.uniform(kw, (F_in, F_out), jnp.float32, -stdv, stdv)
    bias = jax.random.uniform(kb, (F_out,), jnp.float32, -stdv, stdv)

    # Dense (row-normalized) adjacency matrix stand-in for the sparse adjmat.
    adj_raw = jax.random.uniform(ka, (N, N), jnp.float32)
    adjmat = adj_raw / jnp.sum(adj_raw, axis=-1, keepdims=True)

    x = jax.random.normal(kx, (B, N, F_in), jnp.float32)

    out = jax.block_until_ready(graph_convolution(x, weight, adjmat, bias))
    assert out.shape == (B, N, F_out)

    # f32 reference matching the PyTorch module's forward pass.
    hp = jax.lax.Precision.HIGHEST
    sup = jnp.einsum("bnf,fg->bng", x, weight, precision=hp)
    ref = jnp.einsum("nm,bmg->bng", adjmat, sup, precision=hp) + bias
    assert jnp.allclose(out, ref, atol=1e-4, rtol=1e-4), float(
        jnp.max(jnp.abs(out - ref)))

    print("KERNEL_OK")
</pallas_src>

<mosaic_0001>
module attributes {stable_mosaic.version = 11 : i64} {
  func.func @gcn_kernel(%arg0: i32, %arg1: memref<2x64x32xf32, #tpu.memory_space<vmem>>, %arg2: memref<32x32xf32, #tpu.memory_space<vmem>>, %arg3: memref<64x64xf32, #tpu.memory_space<vmem>>, %arg4: memref<1x32xf32, #tpu.memory_space<vmem>>, %arg5: memref<2x64x32xf32, #tpu.memory_space<vmem>>) attributes {dimension_semantics = [#tpu.dimension_semantics<arbitrary>], iteration_bounds = array<i64: 1>, scalar_prefetch = 0 : i64, scratch_operands = 0 : i64, tpu.core_type = #tpu.core_type<tc>, window_params = [{pipeline_mode = #tpu.pipeline_mode<synchronous>, transform_indices = @transform_0, window_bounds = array<i64: 2, 64, 32>}, {pipeline_mode = #tpu.pipeline_mode<synchronous>, transform_indices = @transform_1, window_bounds = array<i64: 32, 32>}, {pipeline_mode = #tpu.pipeline_mode<synchronous>, transform_indices = @transform_2, window_bounds = array<i64: 64, 64>}, {pipeline_mode = #tpu.pipeline_mode<synchronous>, transform_indices = @transform_3, window_bounds = array<i64: 1, 32>}, {pipeline_mode = #tpu.pipeline_mode<synchronous>, transform_indices = @transform_4, window_bounds = array<i64: 2, 64, 32>}]} {
    %c0 = arith.constant 0 : index
    %c0_0 = arith.constant 0 : index
    %c0_1 = arith.constant 0 : index
    %0 = vector.load %arg1[%c0, %c0_0, %c0_1] : memref<2x64x32xf32, #tpu.memory_space<vmem>>, vector<2x64x32xf32>
    %1 = vector.shape_cast %0 : vector<2x64x32xf32> to vector<128x32xf32>
    %c0_2 = arith.constant 0 : index
    %c0_3 = arith.constant 0 : index
    %2 = vector.load %arg2[%c0_2, %c0_3] : memref<32x32xf32, #tpu.memory_space<vmem>>, vector<32x32xf32>
    %cst = arith.constant dense<0.000000e+00> : vector<128x32xf32>
    %3 = tpu.matmul %1, %2, %cst {dimension_numbers = #tpu.dot_dimension_numbers<[1], [0], [0], [1], [0, 0, 1, 1], [], []>, precision = #tpu.contract_precision<fp32>} : vector<128x32xf32>, vector<32x32xf32>, vector<128x32xf32> -> vector<128x32xf32>
    %4 = vector.extract_strided_slice %3 {offsets = [0, 0], sizes = [64, 32], strides = [1, 1]} : vector<128x32xf32> to vector<64x32xf32>
    %5 = vector.extract_strided_slice %3 {offsets = [64, 0], sizes = [64, 32], strides = [1, 1]} : vector<128x32xf32> to vector<64x32xf32>
    %6 = tpu.concatenate %4, %5 in 1 : vector<64x32xf32>, vector<64x32xf32> -> vector<64x64xf32>
    %c0_4 = arith.constant 0 : index
    %c0_5 = arith.constant 0 : index
    %7 = vector.load %arg3[%c0_4, %c0_5] : memref<64x64xf32, #tpu.memory_space<vmem>>, vector<64x64xf32>
    %cst_6 = arith.constant dense<0.000000e+00> : vector<64x64xf32>
    %8 = tpu.matmul %7, %6, %cst_6 {dimension_numbers = #tpu.dot_dimension_numbers<[1], [0], [0], [1], [0, 0, 1, 1], [], []>, precision = #tpu.contract_precision<fp32>} : vector<64x64xf32>, vector<64x64xf32>, vector<64x64xf32> -> vector<64x64xf32>
    %c0_7 = arith.constant 0 : index
    %c0_8 = arith.constant 0 : index
    %9 = vector.load %arg4[%c0_7, %c0_8] : memref<1x32xf32, #tpu.memory_space<vmem>>, vector<1x32xf32>
    %10 = tpu.concatenate %9, %9 in 1 : vector<1x32xf32>, vector<1x32xf32> -> vector<1x64xf32>
    %11 = vector.broadcast %10 : vector<1x64xf32> to vector<64x64xf32>
    %12 = arith.addf %8, %11 : vector<64x64xf32>
    %13 = vector.extract_strided_slice %12 {offsets = [0, 0], sizes = [64, 32], strides = [1, 1]} : vector<64x64xf32> to vector<64x32xf32>
    %c0_9 = arith.constant 0 : index
    %c0_10 = arith.constant 0 : index
    %c0_11 = arith.constant 0 : index
    %14 = vector.load %arg5[%c0_9, %c0_10, %c0_11] : memref<2x64x32xf32, #tpu.memory_space<vmem>>, vector<1x64x32xf32>
    %15 = vector.shape_cast %14 : vector<1x64x32xf32> to vector<64x32xf32>
    %16 = vector.shape_cast %13 : vector<64x32xf32> to vector<1x64x32xf32>
    tpu.vector_store %arg5[%c0_9, %c0_10, %c0_11], %16 {strides = array<i32>} : memref<2x64x32xf32, #tpu.memory_space<vmem>>, vector<1x64x32xf32>,
    %17 = vector.extract_strided_slice %12 {offsets = [0, 32], sizes = [64, 32], strides = [1, 1]} : vector<64x64xf32> to vector<64x32xf32>
    %c1 = arith.constant 1 : index
    %c0_12 = arith.constant 0 : index
    %c0_13 = arith.constant 0 : index
    %18 = vector.load %arg5[%c1, %c0_12, %c0_13] : memref<2x64x32xf32, #tpu.memory_space<vmem>>, vector<1x64x32xf32>
    %19 = vector.shape_cast %18 : vector<1x64x32xf32> to vector<64x32xf32>
    %20 = vector.shape_cast %17 : vector<64x32xf32> to vector<1x64x32xf32>
    tpu.vector_store %arg5[%c1, %c0_12, %c0_13], %20 {strides = array<i32>} : memref<2x64x32xf32, #tpu.memory_space<vmem>>, vector<1x64x32xf32>,
    return
  }
  func.func @transform_0(%arg0: i32) -> (i32, i32, i32) {
    %c0_i32 = arith.constant 0 : i32
    %c0_i32_0 = arith.constant 0 : i32
    %c0_i32_1 = arith.constant 0 : i32
    %c0_i32_2 = arith.constant 0 : i32
    return %c0_i32, %c0_i32_0, %c0_i32_1 : i32, i32, i32
  }
  func.func @transform_1(%arg0: i32) -> (i32, i32) {
    %c0_i32 = arith.constant 0 : i32
    %c0_i32_0 = arith.constant 0 : i32
    %c0_i32_1 = arith.constant 0 : i32
    return %c0_i32, %c0_i32_0 : i32, i32
  }
  func.func @transform_2(%arg0: i32) -> (i32, i32) {
    %c0_i32 = arith.constant 0 : i32
    %c0_i32_0 = arith.constant 0 : i32
    %c0_i32_1 = arith.constant 0 : i32
    return %c0_i32, %c0_i32_0 : i32, i32
  }
  func.func @transform_3(%arg0: i32) -> (i32, i32) {
    %c0_i32 = arith.constant 0 : i32
    %c0_i32_0 = arith.constant 0 : i32
    %c0_i32_1 = arith.constant 0 : i32
    return %c0_i32, %c0_i32_0 : i32, i32
  }
  func.func @transform_4(%arg0: i32) -> (i32, i32, i32) {
    %c0_i32 = arith.constant 0 : i32
    %c0_i32_0 = arith.constant 0 : i32
    %c0_i32_1 = arith.constant 0 : i32
    %c0_i32_2 = arith.constant 0 : i32
    return %c0_i32, %c0_i32_0, %c0_i32_1 : i32, i32, i32
  }
}

</mosaic_0001>

<bundles_post_ra>
// kernel: tpu_custom_call.1
= control target key start
LH: loop header
LB: loop body
LE: loop exit
PB: predicated region body
PF: predicated region fallthrough
CT: control target
= control target key end

     0   :  { %vm37_vm0 = vcmask 261120   ;;  %vm1278_vm1 = vcmask 523264   ;;  %s2781_s19 = smov 96   ;;  %s3751_s1 = inlined_call_operand.vmem [shape: f32[32,32], index: 1, kind: input, shape index: {}]   ;;  %s3752_s0 = inlined_call_operand.vmem [shape: f32[2,64,32], index: 0, kind: input, shape index: {}]   ;;  %s3753_s2 = inlined_call_operand.vmem [shape: f32[64,64], index: 2, kind: input, shape index: {}]   ;;  %s3754_s3 = inlined_call_operand.vmem [shape: f32[1,32], index: 3, kind: input, shape index: {}]   ;;  %s3755_s4 = inlined_call_operand.vmem [shape: f32[2,64,32], index: 4, kind: output, shape index: {}]  }
   0x1   :  { %v36_v0 = vld [vmem:[%s3751_s1 + $0x18] sm:$0xff]  ;;  %v35_v1 = vld [vmem:[%s3751_s1 + $0x10] sm:$0xff]  ;;  %v34_v2 = vld [vmem:[%s3751_s1 + $0x8] sm:$0xff] }
   0x2   :  { %v2816_v3 = vand.u32 4294901760, %v36_v0  ;;  %v2818_v4 = vand.u32 4294901760, %v35_v1  ;;  %v2820_v5 = vand.u32 4294901760, %v34_v2  ;;  %v33_v6 = vld [vmem:[%s3751_s1] sm:$0xff]  ;;  %v18_v8 = vld [vmem:[%s3752_s0 + $0x8] sm:$0xff]  ;;  %v19_v12 = vld [vmem:[%s3752_s0 + $0x10] sm:$0xff] }
   0x3   :  { %v17_v7 = vld [vmem:[%s3752_s0] sm:$0xff]  ;;  %v2831_v9 = vand.u32 4294901760, %v33_v6  ;;  %v42_v11 = vsel %vm37_vm0, %v18_v8, 0  ;;  %v20_v13 = vld [vmem:[%s3752_s0 + $0x18] sm:$0xff]  ;;  %v45_v19 = vsel %vm37_vm0, %v19_v12, 0  ;;  %v22_v39 = vld [vmem:[%s3752_s0 + $0x28] sm:$0xff] }
   0x4   :  { %v39_v10 = vsel %vm37_vm0, %v17_v7, 0  ;;  %2418 = vmatprep.subr.mxu0 %v2816_v3  ;;  %v2843_v14 = vsub.f32 %v36_v0, %v2816_v3  ;;  %v2847_v16 = vand.u32 4294901760, %v42_v11  ;;  %v2850_v17 = vsub.f32 %v35_v1, %v2818_v4  ;;  %v21_v38 = vld [vmem:[%s3752_s0 + $0x20] sm:$0xff]  ;;  %v23_v44 = vld [vmem:[%s3752_s0 + $0x30] sm:$0xff]  ;;  %v24_v45 = vld [vmem:[%s3752_s0 + $0x38] sm:$0xff] }
   0x5   :  { %v2845_v15 = vand.u32 4294901760, %v39_v10  ;;  %2419 = vmatpush3.msra.mxu0 %v2816_v3  ;;  %v2854_v18 = vsub.f32 %v34_v2, %v2820_v5  ;;  %v48_v20 = vsel %vm37_vm0, %v20_v13, 0  ;;  %v2859_v21 = vsub.f32 %v33_v6, %v2831_v9  ;;  %v25_v50 = vld [vmem:[%s3752_s0 + $0x40] sm:$0xff]  ;;  %v26_v51 = vld [vmem:[%s3752_s0 + $0x48] sm:$0xff]  ;;  %v27_v0 = vld [vmem:[%s3752_s0 + $0x50] sm:$0xff] }
   0x6   :  { %2420 = vmatprep.subr.mxu0 %v2818_v4  ;;  %v2863_v22 = vand.u32 4294901760, %v2843_v14  ;;  %v2869_v24 = vsub.f32 %v42_v11, %v2847_v16  ;;  %v2872_v25 = vand.u32 4294901760, %v2850_v17  ;;  %v2879_v27 = vand.u32 4294901760, %v45_v19  ;;  %v28_v1 = vld [vmem:[%s3752_s0 + $0x58] sm:$0xff] }
   0x7   :  { %v2866_v23 = vsub.f32 %v39_v10, %v2845_v15  ;;  %2458 = vmatprep.mubr.f32.mxu1 %v2845_v15  ;;  %2421 = vmatpush3.msra.mxu0 %v2818_v4  ;;  %v2877_v26 = vand.u32 4294901760, %v2854_v18  ;;  %v2881_v28 = vand.u32 4294901760, %v48_v20  ;;  %v2884_v29 = vand.u32 4294901760, %v2859_v21 }
   0x8   :  { %2422 = vmatprep.subr.mxu0 %v2820_v5  ;;  %v343_v30 = vsub.f32 %v2843_v14, %v2863_v22  ;;  %v167_v32 = vand.u32 4294901760, %v2869_v24  ;;  %v350_v33 = vsub.f32 %v2850_v17, %v2872_v25  ;;  %v2897_v35 = vsub.f32 %v45_v19, %v2879_v27 }
   0x9   :  { %v157_v31 = vand.u32 4294901760, %v2866_v23  ;;  %2423 = vmatpush3.msra.mxu0 %v2820_v5  ;;  %v357_v34 = vsub.f32 %v2854_v18, %v2877_v26  ;;  %v2900_v36 = vsub.f32 %v48_v20, %v2881_v28  ;;  %v364_v37 = vsub.f32 %v2859_v21, %v2884_v29 }
   0xa   :  { %2424 = vmatprep.subr.mxu0 %v2831_v9  ;;  %v344_v40 = vand.u32 4294901760, %v343_v30  ;;  %v168_v42 = vsub.f32 %v2869_v24, %v167_v32  ;;  %v351_v43 = vand.u32 4294901760, %v350_v33  ;;  %v177_v47 = vand.u32 4294901760, %v2897_v35 }
   0xb   :  { %v158_v41 = vsub.f32 %v2866_v23, %v157_v31  ;;  %2425 = vmatpush3.msra.mxu0 %v2831_v9  ;;  %v358_v46 = vand.u32 4294901760, %v357_v34  ;;  %v187_v48 = vand.u32 4294901760, %v2900_v36  ;;  %v365_v49 = vand.u32 4294901760, %v364_v37 }
   0xc   :  { %2450 = vmatprep.subr.mxu1 %v344_v40  ;;  %v169_v53 = vand.u32 4294901760, %v168_v42  ;;  %v51_v54 = vsel %vm37_vm0, %v21_v38, 0  ;;  %v54_v55 = vsel %vm37_vm0, %v22_v39, 0  ;;  %2482 = vmatprep.subr.mxu0 %v2843_v14  ;;  %v178_v56 = vsub.f32 %v2897_v35, %v177_v47 }
   0xd   :  { %v159_v52 = vand.u32 4294901760, %v158_v41  ;;  %2451 = vmatpush3.msra.mxu1 %v344_v40  ;;  %v188_v57 = vsub.f32 %v2900_v36, %v187_v48  ;;  %v2941_v58 = vand.u32 4294901760, %v51_v54  ;;  %v2943_v59 = vand.u32 4294901760, %v54_v55 }
   0xe   :  { %2452 = vmatprep.subr.mxu1 %v351_v43  ;;  %v57_v60 = vsel %vm37_vm0, %v23_v44, 0  ;;  %v60_v61 = vsel %vm37_vm0, %v24_v45, 0  ;;  %v63_v62 = vsel %vm37_vm0, %v25_v50, 0  ;;  %v66_v63 = vsel %vm37_vm0, %v26_v51, 0  ;;  %v30_v50 = vld [vmem:[%s3752_s0 + $0x68] sm:$0xff] }
   0xf   :  { %2426 = vmatprep.mubr.f32.mxu0 %v159_v52  ;;  %2453 = vmatpush3.msra.mxu1 %v351_v43  ;;  %v179_v2 = vand.u32 4294901760, %v178_v56  ;;  %v189_v6 = vand.u32 4294901760, %v188_v57  ;;  %v2956_v7 = vsub.f32 %v51_v54, %v2941_v58  ;;  %v2959_v8 = vsub.f32 %v54_v55, %v2943_v59 }
  0x10   :  { %2427 = vmatmul.mubr.f32.vlgmr.msra.gmra.mxu0 %v169_v53  ;;  %2454 = vmatprep.subr.mxu1 %v358_v46  ;;  %v2961_v10 = vand.u32 4294901760, %v57_v60  ;;  %v2963_v11 = vand.u32 4294901760, %v60_v61  ;;  %v2965_v12 = vand.u32 4294901760, %v63_v62  ;;  %v2967_v13 = vand.u32 4294901760, %v66_v63 }
  0x11   :  { %2483 = vmatpush3.msra.mxu0 %v2843_v14  ;;  %2429 = vmatprep.mubr.f32.mxu0 %v179_v2  ;;  %v197_v19 = vand.u32 4294901760, %v2956_v7  ;;  %v207_v20 = vand.u32 4294901760, %v2959_v8  ;;  %v69_v30 = vsel %vm37_vm0, %v27_v0, 0  ;;  %v72_v33 = vsel %vm37_vm0, %v28_v1, 0  ;;  %v32_v0 = vld [vmem:[%s3752_s0 + $0x78] sm:$0xff] }
  0x12   :  { %2455 = vmatpush3.msra.mxu1 %v358_v46  ;;  %v2975_v34 = vsub.f32 %v57_v60, %v2961_v10  ;;  %v2978_v37 = vsub.f32 %v60_v61, %v2963_v11  ;;  %v2981_v38 = vsub.f32 %v63_v62, %v2965_v12  ;;  %v2984_v14 = vsub.f32 %v66_v63, %v2967_v13  ;;  %v31_v63 = vld [vmem:[%s3752_s0 + $0x70] sm:$0xff] }
  0x13   :  { %2456 = vmatprep.subr.mxu1 %v365_v49  ;;  %v198_v39 = vsub.f32 %v2956_v7, %v197_v19  ;;  %v208_v40 = vsub.f32 %v2959_v8, %v207_v20  ;;  %v2992_v41 = vand.u32 4294901760, %v69_v30  ;;  %v2994_v42 = vand.u32 4294901760, %v72_v33  ;;  %2484 = vmatprep.subr.mxu0 %v2850_v17 }
  0x14   :  { %2430 = vmatmul.mubr.f32.gmra.mxu0 %v189_v6  ;;  %2457 = vmatpush3.msra.mxu1 %v365_v49  ;;  %v217_v43 = vand.u32 4294901760, %v2975_v34  ;;  %v227_v44 = vand.u32 4294901760, %v2978_v37  ;;  %v237_v45 = vand.u32 4294901760, %v2981_v38  ;;  %v247_v46 = vand.u32 4294901760, %v2984_v14  ;;  %v29_v49 = vld [vmem:[%s3752_s0 + $0x60] sm:$0xff]  ;;  %s2780_s0 = smov 32  }
  0x15   :  { %2459 = vmatmul.mubr.f32.vlgmr.msra.gmra.mxu1 %v2847_v16  ;;  %2514 = vmatprep.subr.mxu1 %v2816_v3  ;;  %v199_v51 = vand.u32 4294901760, %v198_v39  ;;  %v209_v52 = vand.u32 4294901760, %v208_v40  ;;  %v3010_v53 = vsub.f32 %v69_v30, %v2992_v41  ;;  %v3013_v54 = vsub.f32 %v72_v33, %v2994_v42 }
  0x16   :  { %2461 = vmatprep.mubr.f32.mxu1 %v2879_v27  ;;  %2515 = vmatpush3.msra.mxu1 %v2816_v3  ;;  %v218_v55 = vsub.f32 %v2975_v34, %v217_v43  ;;  %v228_v56 = vsub.f32 %v2978_v37, %v227_v44  ;;  %v238_v57 = vsub.f32 %v2981_v38, %v237_v45  ;;  %v75_v61 = vsel %vm37_vm0, %v29_v49, 0 }
  0x17   :  { %2432 = vmatprep.mubr.f32.mxu0 %v199_v51  ;;  %v257_v60 = vand.u32 4294901760, %v3010_v53  ;;  %v78_v62 = vsel %vm37_vm0, %v30_v50, 0  ;;  %2485 = vmatpush3.msra.mxu0 %v2850_v17  ;;  %v248_v6 = vsub.f32 %v2984_v14, %v247_v46  ;;  %v267_v30 = vand.u32 4294901760, %v3013_v54 }
  0x18   :  { %2433 = vmatmul.mubr.f32.gmra.mxu0 %v209_v52  ;;  %v219_v1 = vand.u32 4294901760, %v218_v55  ;;  %v229_v2 = vand.u32 4294901760, %v228_v56  ;;  %v239_v33 = vand.u32 4294901760, %v238_v57  ;;  %v3045_v39 = vand.u32 4294901760, %v75_v61  ;;  %2486 = vmatprep.subr.mxu0 %v2854_v18 }
  0x19   :  { %2462 = vmatmul.mubr.f32.gmra.mxu1 %v2881_v28  ;;  %v258_v17 = vsub.f32 %v3010_v53, %v257_v60  ;;  %v3047_v40 = vand.u32 4294901760, %v78_v62  ;;  %v81_v49 = vsel %vm37_vm0, %v31_v63, 0  ;;  %v84_v50 = vsel %vm37_vm0, %v32_v0, 0  ;;  %2516 = vmatprep.subr.mxu1 %v2818_v4 }
  0x1a   :  { %2464 = vmatprep.mubr.f32.mxu1 %v2941_v58  ;;  %2435 = vmatprep.mubr.f32.mxu0 %v219_v1  ;;  %v3054_v51 = vsub.f32 %v75_v61, %v3045_v39  ;;  %v249_v55 = vand.u32 4294901760, %v248_v6  ;;  %v268_v56 = vsub.f32 %v3013_v54, %v267_v30  ;;  %v3065_v57 = vand.u32 4294901760, %v81_v49 }
  0x1b   :  { %v3057_v52 = vsub.f32 %v78_v62, %v3047_v40  ;;  %2487 = vmatpush3.msra.mxu0 %v2854_v18  ;;  %2517 = vmatpush3.msra.mxu1 %v2818_v4  ;;  %v3067_v63 = vand.u32 4294901760, %v84_v50  ;;  %v259_v61 = vand.u32 4294901760, %v258_v17 }
  0x1c   :  { %2436 = vmatmul.mubr.f32.gmra.mxu0 %v229_v2  ;;  %v277_v18 = vand.u32 4294901760, %v3054_v51  ;;  %v3073_v0 = vsub.f32 %v81_v49, %v3065_v57  ;;  %2488 = vmatprep.subr.mxu0 %v2859_v21  ;;  %v269_v6 = vand.u32 4294901760, %v268_v56 }
  0x1d   :  { %2465 = vmatmul.mubr.f32.gmra.mxu1 %v2943_v59  ;;  %2438 = vmatprep.mubr.f32.mxu0 %v239_v33  ;;  %v287_v62 = vand.u32 4294901760, %v3057_v52  ;;  %v3076_v1 = vsub.f32 %v84_v50, %v3067_v63 }
  0x1e   :  { %2467 = vmatprep.mubr.f32.mxu1 %v2961_v10  ;;  %2518 = vmatprep.subr.mxu1 %v2820_v5  ;;  %v278_v2 = vsub.f32 %v3054_v51, %v277_v18  ;;  %v297_v17 = vand.u32 4294901760, %v3073_v0 }
  0x1f   :  { %2489 = vmatpush3.msra.mxu0 %v2859_v21  ;;  %2519 = vmatpush3.msra.mxu1 %v2820_v5  ;;  %v288_v33 = vsub.f32 %v3057_v52, %v287_v62  ;;  %v307_v49 = vand.u32 4294901760, %v3076_v1 }
  0x20   :  { %2439 = vmatmul.mubr.f32.gmra.mxu0 %v249_v55  ;;  %v279_v50 = vand.u32 4294901760, %v278_v2  ;;  %v298_v21 = vsub.f32 %v3073_v0, %v297_v17  ;;  %2520 = vmatprep.subr.mxu1 %v2831_v9 }
  0x21   :  { %2468 = vmatmul.mubr.f32.gmra.mxu1 %v2963_v11  ;;  %2441 = vmatprep.mubr.f32.mxu0 %v259_v61  ;;  %v289_v55 = vand.u32 4294901760, %v288_v33  ;;  %v308_v56 = vsub.f32 %v3076_v1, %v307_v49 }
  0x22   :  { %2470 = vmatprep.mubr.f32.mxu1 %v2965_v12  ;;  %2546 = vmatprep.subr.mxu0 %v2863_v22  ;;  %v299_v61 = vand.u32 4294901760, %v298_v21 }
  0x23   :  { %2521 = vmatpush3.msra.mxu1 %v2831_v9  ;;  %v309_v2 = vand.u32 4294901760, %v308_v56 }
  0x24   :  { %2442 = vmatmul.mubr.f32.gmra.mxu0 %v269_v6  ;;  %2578 = vmatprep.subr.mxu1 %v2816_v3 }
  0x25   :  { %2471 = vmatmul.mubr.f32.gmra.mxu1 %v2967_v13  ;;  %2444 = vmatprep.mubr.f32.mxu0 %v279_v50 }
  0x26   :  { %2473 = vmatprep.mubr.f32.mxu1 %v2992_v41 }
  0x28   :  { %2445 = vmatmul.mubr.f32.gmra.mxu0 %v289_v55 }
  0x29   :  { %2474 = vmatmul.mubr.f32.gmra.mxu1 %v2994_v42  ;;  %2447 = vmatprep.mubr.f32.mxu0 %v299_v61 }
  0x2a   :  { %2476 = vmatprep.mubr.f32.mxu1 %v3045_v39 }
  0x2c   :  { %2448 = vmatmul.mubr.f32.gmra.mxu0 %v309_v2 }
  0x2d   :  { %2477 = vmatmul.mubr.f32.gmra.mxu1 %v3047_v40  ;;  %2490 = vmatprep.mubr.f32.mxu0 %v2866_v23 }
  0x2e   :  { %2479 = vmatprep.mubr.f32.mxu1 %v3065_v57 }
  0x30   :  { %2491 = vmatmul.mubr.f32.vlgmr.msra.gmra.mxu0 %v2869_v24 }
  0x31   :  { %2480 = vmatmul.mubr.f32.gmra.mxu1 %v3067_v63  ;;  %2493 = vmatprep.mubr.f32.mxu0 %v2897_v35 }
  0x32   :  { %2522 = vmatprep.mubr.f32.mxu1 %v157_v31  ;;  %2547 = vmatpush3.msra.mxu0 %v2863_v22 }
  0x33   :  { %2548 = vmatprep.subr.mxu0 %v2872_v25 }
  0x34   :  { %2494 = vmatmul.mubr.f32.gmra.mxu0 %v2900_v36 }
  0x35   :  { %2523 = vmatmul.mubr.f32.vlgmr.msra.gmra.mxu1 %v167_v32  ;;  %2496 = vmatprep.mubr.f32.mxu0 %v2956_v7 }
  0x36   :  { %2525 = vmatprep.mubr.f32.mxu1 %v177_v47  ;;  %2579 = vmatpush3.msra.mxu1 %v2816_v3 }
  0x37   :  { %2549 = vmatpush3.msra.mxu0 %v2872_v25  ;;  %2580 = vmatprep.subr.mxu1 %v2818_v4 }
  0x38   :  { %2550 = vmatprep.subr.mxu0 %v2877_v26  ;;  %2497 = vmatmul.mubr.f32.gmra.mxu0 %v2959_v8 }
  0x39   :  { %2526 = vmatmul.mubr.f32.gmra.mxu1 %v187_v48  ;;  %2499 = vmatprep.mubr.f32.mxu0 %v2975_v34 }
  0x3a   :  { %2528 = vmatprep.mubr.f32.mxu1 %v197_v19  ;;  %2551 = vmatpush3.msra.mxu0 %v2877_v26 }
  0x3b   :  { %2581 = vmatpush3.msra.mxu1 %v2818_v4  ;;  %2552 = vmatprep.subr.mxu0 %v2884_v29 }
  0x3c   :  { %2582 = vmatprep.subr.mxu1 %v2820_v5  ;;  %2500 = vmatmul.mubr.f32.gmra.mxu0 %v2978_v37 }
  0x3d   :  { %2529 = vmatmul.mubr.f32.gmra.mxu1 %v207_v20  ;;  %2502 = vmatprep.mubr.f32.mxu0 %v2981_v38 }
  0x3e   :  { %2531 = vmatprep.mubr.f32.mxu1 %v217_v43  ;;  %2553 = vmatpush3.msra.mxu0 %v2884_v29 }
  0x3f   :  { %2583 = vmatpush3.msra.mxu1 %v2820_v5 }
  0x40   :  { %2584 = vmatprep.subr.mxu1 %v2831_v9  ;;  %2503 = vmatmul.mubr.f32.gmra.mxu0 %v2984_v14 }
  0x41   :  { %2532 = vmatmul.mubr.f32.gmra.mxu1 %v227_v44  ;;  %2505 = vmatprep.mubr.f32.mxu0 %v3010_v53 }
  0x42   :  { %2534 = vmatprep.mubr.f32.mxu1 %v237_v45  ;;  %2585 = vmatpush3.msra.mxu1 %v2831_v9 }
  0x44   :  { %2506 = vmatmul.mubr.f32.gmra.mxu0 %v3013_v54 }
  0x45   :  { %2535 = vmatmul.mubr.f32.gmra.mxu1 %v247_v46  ;;  %2508 = vmatprep.mubr.f32.mxu0 %v3054_v51 }
  0x46   :  { %2537 = vmatprep.mubr.f32.mxu1 %v257_v60 }
  0x48   :  { %2509 = vmatmul.mubr.f32.gmra.mxu0 %v3057_v52 }
  0x49   :  { %2538 = vmatmul.mubr.f32.gmra.mxu1 %v267_v30  ;;  %2511 = vmatprep.mubr.f32.mxu0 %v3073_v0 }
  0x4a   :  { %2540 = vmatprep.mubr.f32.mxu1 %v277_v18 }
  0x4c   :  { %2512 = vmatmul.mubr.f32.gmra.mxu0 %v3076_v1 }
  0x4d   :  { %2541 = vmatmul.mubr.f32.gmra.mxu1 %v287_v62  ;;  %2554 = vmatprep.mubr.f32.mxu0 %v2845_v15 }
  0x4e   :  { %2543 = vmatprep.mubr.f32.mxu1 %v297_v17 }
  0x50   :  { %2555 = vmatmul.mubr.f32.vlgmr.msra.gmra.mxu0 %v2847_v16 }
  0x51   :  { %2544 = vmatmul.mubr.f32.gmra.mxu1 %v307_v49  ;;  %2557 = vmatprep.mubr.f32.mxu0 %v2879_v27 }
  0x52   :  { %2586 = vmatprep.mubr.f32.mxu1 %v2845_v15 }
  0x54   :  { %2558 = vmatmul.mubr.f32.gmra.mxu0 %v2881_v28 }
  0x55   :  { %2587 = vmatmul.mubr.f32.vlgmr.msra.gmra.mxu1 %v2847_v16  ;;  %2560 = vmatprep.mubr.f32.mxu0 %v2941_v58 }
  0x56   :  { %2589 = vmatprep.mubr.f32.mxu1 %v2879_v27 }
  0x58   :  { %2561 = vmatmul.mubr.f32.gmra.mxu0 %v2943_v59 }
  0x59   :  { %2590 = vmatmul.mubr.f32.gmra.mxu1 %v2881_v28  ;;  %2563 = vmatprep.mubr.f32.mxu0 %v2961_v10 }
  0x5a   :  { %2592 = vmatprep.mubr.f32.mxu1 %v2941_v58 }
  0x5c   :  { %2564 = vmatmul.mubr.f32.gmra.mxu0 %v2963_v11 }
  0x5d   :  { %2593 = vmatmul.mubr.f32.gmra.mxu1 %v2943_v59  ;;  %2566 = vmatprep.mubr.f32.mxu0 %v2965_v12 }
  0x5e   :  { %2595 = vmatprep.mubr.f32.mxu1 %v2961_v10 }
  0x60   :  { %2567 = vmatmul.mubr.f32.gmra.mxu0 %v2967_v13 }
  0x61   :  { %2596 = vmatmul.mubr.f32.gmra.mxu1 %v2963_v11  ;;  %2569 = vmatprep.mubr.f32.mxu0 %v2992_v41 }
  0x62   :  { %2598 = vmatprep.mubr.f32.mxu1 %v2965_v12 }
  0x64   :  { %2570 = vmatmul.mubr.f32.gmra.mxu0 %v2994_v42 }
  0x65   :  { %2599 = vmatmul.mubr.f32.gmra.mxu1 %v2967_v13  ;;  %2572 = vmatprep.mubr.f32.mxu0 %v3045_v39 }
  0x66   :  { %2601 = vmatprep.mubr.f32.mxu1 %v2992_v41 }
  0x68   :  { %2573 = vmatmul.mubr.f32.gmra.mxu0 %v3047_v40 }
  0x69   :  { %2602 = vmatmul.mubr.f32.gmra.mxu1 %v2994_v42  ;;  %2575 = vmatprep.mubr.f32.mxu0 %v3065_v57 }
  0x6a   :  { %2604 = vmatprep.mubr.f32.mxu1 %v3045_v39 }
  0x6c   :  { %2576 = vmatmul.mubr.f32.gmra.mxu0 %v3067_v63 }
  0x6d   :  { %2605 = vmatmul.mubr.f32.gmra.mxu1 %v3047_v40 }
  0x6e   :  { %2607 = vmatprep.mubr.f32.mxu1 %v3065_v57 }
  0x71   :  { %2608 = vmatmul.mubr.f32.gmra.mxu1 %v3067_v63 }
  0xd0   :  { %v2428_v3 = vpop.f32.mrf.mxu0 }
  0xd2   :  { %v161_v4 = vpop.f32.mrf.mxu0 }
  0xd4   :  { %v2431_v5 = vpop.f32.mrf.mxu0 }
  0xd5   :  { %v2460_v9 = vpop.f32.mrf.mxu1 }
  0xd6   :  { %v181_v15 = vpop.f32.mrf.mxu0  ;;  %v409_v16 = vadd.f32 %v2460_v9, %v2428_v3 }
  0xd7   :  { %v402_v22 = vpop.f32.mrf.mxu1 }
  0xd8   :  { %v403_v23 = vadd.f32 %v402_v22, %v161_v4  ;;  %v2434_v24 = vpop.f32.mrf.mxu0 }
  0xd9   :  { %v2463_v25 = vpop.f32.mrf.mxu1 }
  0xda   :  { %v421_v26 = vadd.f32 %v2463_v25, %v2431_v5  ;;  %v201_v27 = vpop.f32.mrf.mxu0 }
  0xdb   :  { %v414_v28 = vpop.f32.mrf.mxu1 }
  0xdc   :  { %v415_v29 = vadd.f32 %v414_v28, %v181_v15  ;;  %v2437_v31 = vpop.f32.mrf.mxu0 }
  0xdd   :  { %v2466_v32 = vpop.f32.mrf.mxu1 }
  0xde   :  { %v433_v35 = vadd.f32 %v2466_v32, %v2434_v24  ;;  %v221_v36 = vpop.f32.mrf.mxu0 }
  0xdf   :  { %v426_v47 = vpop.f32.mrf.mxu1 }
  0xe0   :  { %v427_v48 = vadd.f32 %v426_v47, %v201_v27  ;;  %v2440_v58 = vpop.f32.mrf.mxu0 }
  0xe1   :  { %v2469_v59 = vpop.f32.mrf.mxu1 }
  0xe2   :  { %v445_v7 = vadd.f32 %v2469_v59, %v2437_v31  ;;  %v241_v8 = vpop.f32.mrf.mxu0 }
  0xe3   :  { %v438_v10 = vpop.f32.mrf.mxu1 }
  0xe4   :  { %v439_v11 = vadd.f32 %v438_v10, %v221_v36  ;;  %v2443_v12 = vpop.f32.mrf.mxu0 }
  0xe5   :  { %v2472_v13 = vpop.f32.mrf.mxu1 }
  0xe6   :  { %v3203_v19 = vadd.f32 %v2472_v13, %v2440_v58  ;;  %v261_v20 = vpop.f32.mrf.mxu0 }
  0xe7   :  { %v450_v34 = vpop.f32.mrf.mxu1 }
  0xe8   :  { %v3205_v37 = vadd.f32 %v450_v34, %v241_v8  ;;  %v3207_v38 = vpop.f32.mrf.mxu0 }
  0xe9   :  { %v2475_v14 = vpop.f32.mrf.mxu1 }
  0xea   :  { %v3209_v41 = vadd.f32 %v2475_v14, %v2443_v12  ;;  %v3211_v42 = vpop.f32.mrf.mxu0 }
  0xeb   :  { %v462_v43 = vpop.f32.mrf.mxu1 }
  0xec   :  { %v3213_v44 = vadd.f32 %v462_v43, %v261_v20  ;;  %v3215_v45 = vpop.f32.mrf.mxu0 }
  0xed   :  { %v3217_v46 = vpop.f32.mrf.mxu1 }
  0xee   :  { %v3219_v53 = vpop.f32.mrf.mxu0 }
  0xef   :  { %v3221_v54 = vpop.f32.mrf.mxu1 }
  0xf0   :  { %v2492_v60 = vpop.f32.mrf.mxu0 }
  0xf1   :  { %v3223_v30 = vpop.f32.mrf.mxu1  ;;  %v580_v39 = vadd.f32 %v2492_v60, %v409_v16 }
  0xf2   :  { %v572_v40 = vpop.f32.mrf.mxu0 }
  0xf3   :  { %v3225_v51 = vpop.f32.mrf.mxu1  ;;  %v573_v52 = vadd.f32 %v572_v40, %v403_v23 }
  0xf4   :  { %v2495_v57 = vpop.f32.mrf.mxu0 }
  0xf5   :  { %v2524_v63 = vpop.f32.mrf.mxu1  ;;  %v594_v18 = vadd.f32 %v2495_v57, %v421_v26 }
  0xf6   :  { %v763_v62 = vadd.f32 %v2524_v63, %v580_v39  ;;  %v586_v0 = vpop.f32.mrf.mxu0 }
  0xf7   :  { %v754_v1 = vpop.f32.mrf.mxu1  ;;  %v587_v6 = vadd.f32 %v586_v0, %v415_v29 }
  0xf8   :  { %v755_v33 = vadd.f32 %v754_v1, %v573_v52  ;;  %v2498_v17 = vpop.f32.mrf.mxu0 }
  0xf9   :  { %v2527_v49 = vpop.f32.mrf.mxu1  ;;  %v608_v50 = vadd.f32 %v2498_v17, %v433_v35 }
  0xfa   :  { %v779_v21 = vadd.f32 %v2527_v49, %v594_v18  ;;  %v600_v55 = vpop.f32.mrf.mxu0 }
  0xfb   :  { %v770_v56 = vpop.f32.mrf.mxu1  ;;  %v601_v61 = vadd.f32 %v600_v55, %v427_v48 }
  0xfc   :  { %v771_v2 = vadd.f32 %v770_v56, %v587_v6  ;;  %v2501_v3 = vpop.f32.mrf.mxu0 }
  0xfd   :  { %v2530_v4 = vpop.f32.mrf.mxu1  ;;  %v622_v5 = vadd.f32 %v2501_v3, %v445_v7 }
  0xfe   :  { %v795_v9 = vadd.f32 %v2530_v4, %v608_v50  ;;  %v614_v15 = vpop.f32.mrf.mxu0 }
  0xff   :  { %v786_v16 = vpop.f32.mrf.mxu1  ;;  %v615_v22 = vadd.f32 %v614_v15, %v439_v11 }
 0x100   :  { %v787_v23 = vadd.f32 %v786_v16, %v601_v61  ;;  %v3227_v24 = vpop.f32.mrf.mxu0 }
 0x101   :  { %v2533_v25 = vpop.f32.mrf.mxu1 }
 0x102   :  { %v811_v26 = vadd.f32 %v2533_v25, %v622_v5  ;;  %v3229_v27 = vpop.f32.mrf.mxu0 }
 0x103   :  { %v802_v28 = vpop.f32.mrf.mxu1 }
 0x104   :  { %v803_v29 = vadd.f32 %v802_v28, %v615_v22  ;;  %v3231_v31 = vpop.f32.mrf.mxu0 }
 0x105   :  { %v3233_v32 = vpop.f32.mrf.mxu1 }
 0x106   :  { %v3235_v35 = vpop.f32.mrf.mxu0 }
 0x107   :  { %v3237_v36 = vpop.f32.mrf.mxu1 }
 0x108   :  { %v2510_v47 = vpop.f32.mrf.mxu0 }
 0x109   :  { %v3239_v48 = vpop.f32.mrf.mxu1 }
 0x10a   :  { %v656_v58 = vpop.f32.mrf.mxu0 }
 0x10b   :  { %v3241_v59 = vpop.f32.mrf.mxu1 }
 0x10c   :  { %v2513_v7 = vpop.f32.mrf.mxu0 }
 0x10d   :  { %v2542_v8 = vpop.f32.mrf.mxu1 }
 0x10e   :  { %v670_v10 = vpop.f32.mrf.mxu0 }
 0x10f   :  { %v850_v11 = vpop.f32.mrf.mxu1 }
 0x110   :  { %v2556_v12 = vpop.f32.mrf.mxu0 }
 0x111   :  { %v2545_v13 = vpop.f32.mrf.mxu1  ;;  %v964_v20 = vadd.f32 %v2556_v12, %v763_v62 }
 0x112   :  { %v957_v34 = vpop.f32.mrf.mxu0 }
 0x113   :  { %v3243_v14 = vpop.f32.mrf.mxu1  ;;  %v958_v43 = vadd.f32 %v957_v34, %v755_v33 }
 0x114   :  { %v2559_v60 = vpop.f32.mrf.mxu0 }
 0x115   :  { %v2588_v39 = vpop.f32.mrf.mxu1  ;;  %v976_v40 = vadd.f32 %v2559_v60, %v779_v21 }
 0x116   :  { %v3245_v52 = vadd.f32 %v2588_v39, %v964_v20  ;;  %v969_v57 = vpop.f32.mrf.mxu0 }
 0x117   :  { %v1122_v63 = vpop.f32.mrf.mxu1  ;;  %v970_v18 = vadd.f32 %v969_v57, %v771_v2  ;;  %v493_v57 = vadd.f32 %v3223_v30, %v3215_v45 }
 0x118   :  { %v3247_v0 = vadd.f32 %v1122_v63, %v958_v43  ;;  %v2562_v1 = vpop.f32.mrf.mxu0 }
 0x119   :  { %v2591_v6 = vpop.f32.mrf.mxu1  ;;  %v988_v17 = vadd.f32 %v2562_v1, %v795_v9 }
 0x11a   :  { %v3249_v49 = vadd.f32 %v2591_v6, %v976_v40  ;;  %v981_v62 = vpop.f32.mrf.mxu0  ;;  %v475_v40 = vadd.f32 %v3221_v54, %v3211_v42  ;;  %v643_v42 = vadd.f32 %v3235_v35, %v3213_v44 }
 0x11b   :  { %v1134_v50 = vpop.f32.mrf.mxu1  ;;  %v982_v55 = vadd.f32 %v981_v62, %v787_v23 }
 0x11c   :  { %v3251_v56 = vadd.f32 %v1134_v50, %v970_v18  ;;  %v2565_v33 = vpop.f32.mrf.mxu0  ;;  %v657_v6 = vadd.f32 %v656_v58, %v475_v40  ;;  %v835_v58 = vadd.f32 %v3241_v59, %v643_v42  ;;  %v629_v59 = vadd.f32 %v3229_v27, %v3205_v37  ;;  %v1258_v37 = vld [vmem:[%s3753_s2 + $0x10] sm:$0xff] }
 0x11d   :  { %v2594_v61 = vpop.f32.mrf.mxu1  ;;  %v1000_v21 = vadd.f32 %v2565_v33, %v811_v26  ;;  %v481_v26 = vadd.f32 %v3217_v46, %v3207_v38  ;;  %v487_v46 = vadd.f32 %v3225_v51, %v3219_v53  ;;  %v1256_v53 = vld [vmem:[%s3753_s2] sm:$0xff] }
 0x11e   :  { %v3253_v3 = vadd.f32 %v2594_v61, %v988_v17  ;;  %v993_v4 = vpop.f32.mrf.mxu0  ;;  %v678_v17 = vadd.f32 %v2513_v7, %v493_v57  ;;  %v1280_v35 = vsel %vm1278_vm1, %v1256_v53, 0 }
 0x11f   :  { %v1146_v5 = vpop.f32.mrf.mxu1  ;;  %v994_v2 = vadd.f32 %v993_v4, %v803_v29  ;;  %v664_v43 = vadd.f32 %v2510_v47, %v481_v26  ;;  %v851_v47 = vadd.f32 %v850_v11, %v657_v6  ;;  %v671_v61 = vadd.f32 %v670_v10, %v487_v46  ;;  %v1257_v10 = vld [vmem:[%s3753_s2 + $0x8] sm:$0xff] }
 0x120   :  { %v3255_v15 = vadd.f32 %v1146_v5, %v982_v55  ;;  %v3257_v16 = vpop.f32.mrf.mxu0  ;;  %v875_v55 = vadd.f32 %v2545_v13, %v678_v17  ;;  %v1283_v4 = vsel %vm1278_vm1, %v1257_v10, 0  ;;  %v650_v5 = vadd.f32 %v3231_v31, %v3209_v41 }
 0x121   :  { %v2597_v9 = vpop.f32.mrf.mxu1  ;;  %v859_v63 = vadd.f32 %v2542_v8, %v664_v43  ;;  %v867_v51 = vadd.f32 %v3243_v14, %v671_v61  ;;  %v3308_v26 = vsel %vm1278_vm1, %v1258_v37, 0  ;;  %v3370_v42 = vand.u32 4294901760, %v1283_v4 }
 0x122   :  { %v3259_v22 = vadd.f32 %v2597_v9, %v1000_v21  ;;  %v3261_v25 = vpop.f32.mrf.mxu0  ;;  %v3291_v21 = vand.u32 4294901760, %v1280_v35  ;;  %v819_v9 = vadd.f32 %v3237_v36, %v629_v59  ;;  %v843_v27 = vadd.f32 %v3239_v48, %v650_v5  ;;  %v1259_v36 = vld [vmem:[%s3753_s2 + $0x18] sm:$0xff] }
 0x123   :  { %v1158_v23 = vpop.f32.mrf.mxu1  ;;  %v3315_v43 = vsel %vm1278_vm1, %v1259_v36, 0  ;;  %v3383_v53 = vsub.f32 %v1283_v4, %v3370_v42 }
 0x124   :  { %v3263_v28 = vadd.f32 %v1158_v23, %v994_v2  ;;  %v2571_v12 = vpop.f32.mrf.mxu0  ;;  %v3300_v23 = vsub.f32 %v1280_v35, %v3291_v21  ;;  %2654 = vmatprep.mubr.f32.mxu1 %v3291_v21  ;;  %v1006_v40 = vadd.f32 %v3261_v25, %v819_v9  ;;  %v1261_v25 = vld [vmem:[%s3753_s2 + $0x28] sm:$0xff] }
 0x125   :  { %v3265_v20 = vpop.f32.mrf.mxu1  ;;  %v1024_v48 = vadd.f32 %v2571_v12, %v843_v27  ;;  %v3337_v6 = vsel %vm1278_vm1, %v1261_v25, 0  ;;  %v1388_v5 = vand.u32 4294901760, %v3383_v53 }
 0x126   :  { %v1017_v34 = vpop.f32.mrf.mxu0 }
 0x127   :  { %v3269_v29 = vpop.f32.mrf.mxu1  ;;  %v1018_v14 = vadd.f32 %v1017_v34, %v835_v58  ;;  %v1378_v34 = vand.u32 4294901760, %v3300_v23 }
 0x128   :  { %v2574_v60 = vpop.f32.mrf.mxu0 }
 0x129   :  { %v2603_v39 = vpop.f32.mrf.mxu1  ;;  %v1036_v62 = vadd.f32 %v2574_v60, %v859_v63  ;;  %v636_v60 = vadd.f32 %v3227_v24, %v3203_v19  ;;  %v1379_v57 = vsub.f32 %v3300_v23, %v1378_v34  ;;  %v1260_v63 = vld [vmem:[%s3753_s2 + $0x20] sm:$0xff] }
 0x12a   :  { %v1029_v18 = vpop.f32.mrf.mxu0  ;;  %v1189_v19 = vadd.f32 %v2603_v39, %v1024_v48  ;;  %v3331_v24 = vsel %vm1278_vm1, %v1260_v63, 0 }
 0x12b   :  { %v1182_v1 = vpop.f32.mrf.mxu1  ;;  %v1030_v45 = vadd.f32 %v1029_v18, %v851_v47  ;;  %v827_v18 = vadd.f32 %v3233_v32, %v636_v60  ;;  %v1380_v12 = vand.u32 4294901760, %v1379_v57  ;;  %v3436_v60 = vand.u32 4294901760, %v3331_v24 }
 0x12c   :  { %v2577_v50 = vpop.f32.mrf.mxu0  ;;  %v1183_v41 = vadd.f32 %v1182_v1, %v1018_v14  ;;  %v1171_v1 = vadd.f32 %v3269_v29, %v1006_v40  ;;  %v1262_v29 = vld [vmem:[%s3753_s2 + $0x30] sm:$0xff]  ;;  %v3412_v14 = vand.u32 4294901760, %v3315_v43  ;;  %v1389_v57 = vsub.f32 %v3383_v53, %v1388_v5 }
 0x12d   :  { %v2606_v38 = vpop.f32.mrf.mxu1  ;;  %v1048_v30 = vadd.f32 %v2577_v50, %v875_v55  ;;  %v1012_v17 = vadd.f32 %v3257_v16, %v827_v18  ;;  %2626 = vmatprep.mubr.f32.mxu0 %v1380_v12  ;;  %v3347_v39 = vsel %vm1278_vm1, %v1262_v29, 0  ;;  %v1263_v16 = vld [vmem:[%s3753_s2 + $0x38] sm:$0xff]  ;;  %v1266_v50 = vlaneseq }
 0x12e   :  { %v1201_v33 = vadd.f32 %v2606_v38, %v1036_v62  ;;  %v1041_v7 = vpop.f32.mrf.mxu0  ;;  %v3354_v62 = vsel %vm1278_vm1, %v1263_v16, 0  ;;  %v3455_v63 = vsub.f32 %v3315_v43, %v3412_v14  ;;  %v3458_v18 = vand.u32 4294901760, %v3337_v6 }
 0x12f   :  { %v1194_v54 = vpop.f32.mrf.mxu1  ;;  %v1042_v2 = vadd.f32 %v1041_v7, %v867_v51  ;;  %v1177_v32 = vadd.f32 %v3265_v20, %v1012_v17  ;;  %v3356_v38 = vshrl.u32 %v1266_v50, 7  ;;  %v3361_v20 = vld [vmem:[%s3754_s3] sm:$0x1]  ;;  %v3476_v29 = vsub.f32 %v3331_v24, %v3436_v60 }
 0x130   :  { %1234 = vrot.lane.b32.xlu1 %v1201_v33, %s2780_s0  ;;  %v1195_v11 = vadd.f32 %v1194_v54, %v1030_v45  ;;  %v3494_v24 = vsub.f32 %v3337_v6, %v3458_v18 }
 0x131   :  { %v2609_v8 = vpop.f32.mrf.mxu1  ;;  %v1268_v46 = vsub.s32 0, %v3356_v38 }
 0x132   :  { %v1213_v44 = vadd.f32 %v2609_v8, %v1048_v30 }
 0x133   :  { %v1206_v13 = vpop.f32.mrf.mxu1  ;;  %v1269_v47 = vrot.slane %v3361_v20, %v1268_v46 }
 0x134   :  { %1238 = vrot.lane.b32.xlu0 %v1213_v44, %s2780_s0  ;;  %1232 = vrot.lane.b32.xlu1 %v1195_v11, %s2780_s0  ;;  %v1207_v31 = vadd.f32 %v1206_v13, %v1042_v2  ;;  %v3393_v44 = vand.u32 4294901760, %v3308_v26 }
 0x136   :  { %v3425_v27 = vsub.f32 %v3308_v26, %v3393_v44 }
 0x138   :  { %1228 = vrot.lane.b32.xlu1 %v1183_v41, %s2780_s0  ;;  %1236 = vrot.lane.b32.xlu0 %v1207_v31, %s2780_s0 }
 0x13c   :  { %1224 = vrot.lane.b32.xlu1 %v1171_v1, %s2780_s0  ;;  %1230 = vrot.lane.b32.xlu0 %v1189_v19, %s2780_s0 }
 0x140   :  { %1226 = vrot.lane.b32.xlu0 %v1177_v32, %s2780_s0  ;;  %v1398_v32 = vand.u32 4294901760, %v3425_v27 }
 0x142   :  { %v1399_v6 = vsub.f32 %v3425_v27, %v1398_v32 }
 0x144   :  { %1270 = vrot.lane.b32.xlu0 %v1269_v47, %s2780_s0 }
 0x1a2   :  { %v1235_v55 = vpop.permute.xlu1 %1234 }
 0x1a3   :  { %v1253_v33 = vsel %vm37_vm0, %v3253_v3, %v1235_v55 }
 0x1a4   :  { %v3372_v54 = vand.u32 4294901760, %v1253_v33 }
 0x1a6   :  { %v1239_v61 = vpop.permute.xlu0 %1238  ;;  %v1233_v45 = vpop.permute.xlu1 %1232  ;;  %v3386_v3 = vsub.f32 %v1253_v33, %v3372_v54  ;;  %v1408_v33 = vand.u32 4294901760, %v3455_v63 }
 0x1a7   :  { %v1255_v30 = vsel %vm37_vm0, %v3259_v22, %v1239_v61  ;;  %v1252_v58 = vsel %vm37_vm0, %v3255_v15, %v1233_v45 }
 0x1a8   :  { %v3378_v7 = vand.u32 4294901760, %v1255_v30  ;;  %v3380_v8 = vand.u32 4294901760, %v1252_v58  ;;  %v3421_v37 = vand.u32 4294901760, %v3386_v3 }
 0x1aa   :  { %v3389_v51 = vsub.f32 %v1255_v30, %v3378_v7  ;;  %2610 = vmatprep.subr.mxu0 %v3378_v7  ;;  %v1229_v11 = vpop.permute.xlu1 %1228  ;;  %v1237_v22 = vpop.permute.xlu0 %1236  ;;  %v3396_v15 = vsub.f32 %v1252_v58, %v3380_v8  ;;  %v1490_v12 = vsub.f32 %v3386_v3, %v3421_v37  ;;  %v3503_v58 = vand.u32 4294901760, %v3347_v39 }
 0x1ab   :  { %v1250_v35 = vsel %vm37_vm0, %v3251_v56, %v1229_v11  ;;  %v1254_v10 = vsel %vm37_vm0, %v3263_v28, %v1237_v22  ;;  %2611 = vmatpush3.msra.mxu0 %v3378_v7  ;;  %v1390_v11 = vand.u32 4294901760, %v1389_v57  ;;  %v1418_v22 = vand.u32 4294901760, %v3476_v29 }
 0x1ac   :  { %v3403_v59 = vand.u32 4294901760, %v1250_v35  ;;  %v3405_v13 = vand.u32 4294901760, %v1254_v10  ;;  %v3408_v4 = vand.u32 4294901760, %v3389_v51  ;;  %v3433_v36 = vand.u32 4294901760, %v3396_v15 }
 0x1ad   :  { %v1491_v45 = vand.u32 4294901760, %v1490_v12  ;;  %v3530_v57 = vsub.f32 %v3347_v39, %v3503_v58 }
 0x1ae   :  { %v3415_v2 = vsub.f32 %v1254_v10, %v3405_v13  ;;  %v1225_v56 = vpop.permute.xlu1 %1224  ;;  %2612 = vmatprep.subr.mxu0 %v3405_v13  ;;  %v1231_v28 = vpop.permute.xlu0 %1230  ;;  %v1476_v9 = vsub.f32 %v3389_v51, %v3408_v4  ;;  %v3439_v40 = vsub.f32 %v1250_v35, %v3403_v59  ;;  %v1497_v17 = vsub.f32 %v3396_v15, %v3433_v36 }
 0x1af   :  { %v1248_v41 = vsel %vm37_vm0, %v3247_v0, %v1225_v56  ;;  %v1251_v31 = vsel %vm37_vm0, %v3249_v49, %v1231_v28  ;;  %2613 = vmatpush3.msra.mxu0 %v3405_v13  ;;  %v3517_v28 = vand.u32 4294901760, %v3354_v62 }
 0x1b0   :  { %v3441_v48 = vand.u32 4294901760, %v1251_v31  ;;  %2614 = vmatprep.subr.mxu0 %v3372_v54  ;;  %v1477_v26 = vand.u32 4294901760, %v1476_v9  ;;  %v3445_v0 = vand.u32 4294901760, %v3415_v2  ;;  %v3447_v49 = vand.u32 4294901760, %v1248_v41 }
 0x1b1   :  { %2615 = vmatpush3.msra.mxu0 %v3372_v54  ;;  %v1498_v35 = vand.u32 4294901760, %v1497_v17  ;;  %v1409_v9 = vsub.f32 %v3455_v63, %v1408_v33  ;;  %v3540_v17 = vsub.f32 %v3354_v62, %v3517_v28 }
 0x1b2   :  { %v3461_v1 = vsub.f32 %v1251_v31, %v3441_v48  ;;  %2616 = vmatprep.subr.mxu0 %v3380_v8  ;;  %2638 = vmatprep.subr.mxu1 %v1477_v26  ;;  %v1227_v19 = vpop.permute.xlu0 %1226  ;;  %v1483_v25 = vsub.f32 %v3415_v2, %v3445_v0  ;;  %v3488_v55 = vsub.f32 %v1248_v41, %v3447_v49 }
 0x1b3   :  { %v1249_v43 = vsel %vm37_vm0, %v3245_v52, %v1227_v19  ;;  %2617 = vmatpush3.msra.mxu0 %v3380_v8  ;;  %2639 = vmatpush3.msra.mxu1 %v1477_v26  ;;  %v3485_v52 = vand.u32 4294901760, %v3439_v40  ;;  %v1428_v26 = vand.u32 4294901760, %v3494_v24  ;;  %v1400_v19 = vand.u32 4294901760, %v1399_v6 }
 0x1b4   :  { %v3478_v16 = vand.u32 4294901760, %v1249_v43  ;;  %2618 = vmatprep.subr.mxu0 %v3441_v48  ;;  %v1484_v50 = vand.u32 4294901760, %v1483_v25  ;;  %v3482_v47 = vand.u32 4294901760, %v3461_v1  ;;  %v3524_v41 = vand.u32 4294901760, %v3488_v55 }
 0x1b5   :  { %2619 = vmatpush3.msra.mxu0 %v3441_v48  ;;  %v1511_v10 = vsub.f32 %v3439_v40, %v3485_v52  ;;  %v1410_v39 = vand.u32 4294901760, %v1409_v9  ;;  %v1448_v6 = vand.u32 4294901760, %v3540_v17 }
 0x1b6   :  { %v3497_v61 = vsub.f32 %v1249_v43, %v3478_v16  ;;  %2620 = vmatprep.subr.mxu0 %v3403_v59  ;;  %2640 = vmatprep.subr.mxu1 %v1484_v50  ;;  %v1504_v30 = vsub.f32 %v3461_v1, %v3482_v47  ;;  %v1419_v43 = vsub.f32 %v3476_v29, %v1418_v22 }
 0x1b7   :  { %2621 = vmatpush3.msra.mxu0 %v3403_v59  ;;  %2641 = vmatpush3.msra.mxu1 %v1484_v50  ;;  %v1512_v12 = vand.u32 4294901760, %v1511_v10  ;;  %v1525_v50 = vsub.f32 %v3488_v55, %v3524_v41 }
 0x1b8   :  { %2622 = vmatprep.subr.mxu0 %v3478_v16  ;;  %2642 = vmatprep.subr.mxu1 %v1491_v45  ;;  %v3514_v56 = vand.u32 4294901760, %v3497_v61  ;;  %v1505_v31 = vand.u32 4294901760, %v1504_v30  ;;  %v1438_v30 = vand.u32 4294901760, %v3530_v57 }
 0x1b9   :  { %2623 = vmatpush3.msra.mxu0 %v3478_v16  ;;  %2643 = vmatpush3.msra.mxu1 %v1491_v45  ;;  %v1429_v45 = vsub.f32 %v3494_v24, %v1428_v26 }
 0x1ba   :  { %2624 = vmatprep.subr.mxu0 %v3447_v49  ;;  %2644 = vmatprep.subr.mxu1 %v1498_v35  ;;  %v1518_v25 = vsub.f32 %v3497_v61, %v3514_v56  ;;  %v1439_v10 = vsub.f32 %v3530_v57, %v1438_v30 }
 0x1bb   :  { %2625 = vmatpush3.msra.mxu0 %v3447_v49  ;;  %2645 = vmatpush3.msra.mxu1 %v1498_v35  ;;  %v1430_v35 = vand.u32 4294901760, %v1429_v45 }
 0x1bc   :  { %2627 = vmatmul.mubr.f32.vlgmr.msra.gmra.mxu0 %v1390_v11  ;;  %2646 = vmatprep.subr.mxu1 %v1505_v31  ;;  %v1519_v62 = vand.u32 4294901760, %v1518_v25  ;;  %v1420_v11 = vand.u32 4294901760, %v1419_v43  ;;  %v1440_v9 = vand.u32 4294901760, %v1439_v10 }
 0x1bd   :  { %2666 = vmatprep.subr.mxu0 %v3389_v51  ;;  %2647 = vmatpush3.msra.mxu1 %v1505_v31 }
 0x1be   :  { %2667 = vmatpush3.msra.mxu0 %v3389_v51  ;;  %2648 = vmatprep.subr.mxu1 %v1512_v12  ;;  %v1526_v51 = vand.u32 4294901760, %v1525_v50 }
 0x1bf   :  { %2668 = vmatprep.subr.mxu0 %v3415_v2  ;;  %2629 = vmatprep.mubr.f32.mxu0 %v1400_v19 }
 0x1c0   :  { %2649 = vmatpush3.msra.mxu1 %v1512_v12  ;;  %2669 = vmatpush3.msra.mxu0 %v3415_v2  ;;  %v1449_v2 = vsub.f32 %v3540_v17, %v1448_v6 }
 0x1c1   :  { %2630 = vmatmul.mubr.f32.gmra.mxu0 %v1410_v39  ;;  %2650 = vmatprep.subr.mxu1 %v1519_v62 }
 0x1c2   :  { %2670 = vmatprep.subr.mxu0 %v3386_v3  ;;  %2651 = vmatpush3.msra.mxu1 %v1519_v62 }
 0x1c3   :  { %2671 = vmatpush3.msra.mxu0 %v3386_v3  ;;  %2652 = vmatprep.subr.mxu1 %v1526_v51  ;;  %v1450_v3 = vand.u32 4294901760, %v1449_v2 }
 0x1c4   :  { %2672 = vmatprep.subr.mxu0 %v3396_v15  ;;  %2632 = vmatprep.mubr.f32.mxu0 %v1420_v11 }
 0x1c5   :  { %2653 = vmatpush3.msra.mxu1 %v1526_v51  ;;  %2673 = vmatpush3.msra.mxu0 %v3396_v15 }
 0x1c6   :  { %2633 = vmatmul.mubr.f32.gmra.mxu0 %v1430_v35  ;;  %2655 = vmatmul.mubr.f32.vlgmr.msra.gmra.mxu1 %v3370_v42 }
 0x1c7   :  { %2674 = vmatprep.subr.mxu0 %v3461_v1  ;;  %2694 = vmatprep.subr.mxu1 %v3378_v7 }
 0x1c8   :  { %2675 = vmatpush3.msra.mxu0 %v3461_v1  ;;  %2695 = vmatpush3.msra.mxu1 %v3378_v7 }
 0x1c9   :  { %2676 = vmatprep.subr.mxu0 %v3439_v40  ;;  %2696 = vmatprep.subr.mxu1 %v3405_v13 }
 0x1ca   :  { %2635 = vmatprep.mubr.f32.mxu0 %v1440_v9  ;;  %2657 = vmatprep.mubr.f32.mxu1 %v3393_v44 }
 0x1cb   :  { %2677 = vmatpush3.msra.mxu0 %v3439_v40  ;;  %2697 = vmatpush3.msra.mxu1 %v3405_v13 }
 0x1cc   :  { %2636 = vmatmul.mubr.f32.gmra.mxu0 %v1450_v3  ;;  %2658 = vmatmul.mubr.f32.gmra.mxu1 %v3412_v14 }
 0x1cd   :  { %2678 = vmatprep.subr.mxu0 %v3497_v61  ;;  %2698 = vmatprep.subr.mxu1 %v3372_v54 }
 0x1ce   :  { %2679 = vmatpush3.msra.mxu0 %v3497_v61  ;;  %2699 = vmatpush3.msra.mxu1 %v3372_v54 }
 0x1cf   :  { %2680 = vmatprep.subr.mxu0 %v3488_v55  ;;  %2700 = vmatprep.subr.mxu1 %v3380_v8 }
 0x1d0   :  { %2660 = vmatprep.mubr.f32.mxu1 %v3436_v60  ;;  %2681 = vmatpush3.msra.mxu0 %v3488_v55 }
 0x1d1   :  { %2682 = vmatprep.mubr.f32.mxu0 %v3300_v23  ;;  %2701 = vmatpush3.msra.mxu1 %v3380_v8 }
 0x1d2   :  { %2661 = vmatmul.mubr.f32.gmra.mxu1 %v3458_v18  ;;  %2683 = vmatmul.mubr.f32.vlgmr.msra.gmra.mxu0 %v3383_v53 }
 0x1d3   :  { %2702 = vmatprep.subr.mxu1 %v3441_v48  ;;  %2722 = vmatprep.subr.mxu0 %v3408_v4 }
 0x1d4   :  { %2703 = vmatpush3.msra.mxu1 %v3441_v48  ;;  %2723 = vmatpush3.msra.mxu0 %v3408_v4 }
 0x1d5   :  { %2704 = vmatprep.subr.mxu1 %v3403_v59  ;;  %2724 = vmatprep.subr.mxu0 %v3445_v0 }
 0x1d6   :  { %2663 = vmatprep.mubr.f32.mxu1 %v3503_v58  ;;  %2685 = vmatprep.mubr.f32.mxu0 %v3425_v27 }
 0x1d7   :  { %2705 = vmatpush3.msra.mxu1 %v3403_v59  ;;  %2725 = vmatpush3.msra.mxu0 %v3445_v0 }
 0x1d8   :  { %2664 = vmatmul.mubr.f32.gmra.mxu1 %v3517_v28  ;;  %2686 = vmatmul.mubr.f32.gmra.mxu0 %v3455_v63 }
 0x1d9   :  { %2706 = vmatprep.subr.mxu1 %v3478_v16  ;;  %2726 = vmatprep.subr.mxu0 %v3421_v37 }
 0x1da   :  { %2707 = vmatpush3.msra.mxu1 %v3478_v16  ;;  %2727 = vmatpush3.msra.mxu0 %v3421_v37 }
 0x1db   :  { %2708 = vmatprep.subr.mxu1 %v3447_v49  ;;  %2728 = vmatprep.subr.mxu0 %v3433_v36 }
 0x1dc   :  { %2688 = vmatprep.mubr.f32.mxu0 %v3476_v29  ;;  %2709 = vmatpush3.msra.mxu1 %v3447_v49 }
 0x1dd   :  { %2710 = vmatprep.mubr.f32.mxu1 %v1378_v34  ;;  %2729 = vmatpush3.msra.mxu0 %v3433_v36 }
 0x1de   :  { %2689 = vmatmul.mubr.f32.gmra.mxu0 %v3494_v24  ;;  %2711 = vmatmul.mubr.f32.vlgmr.msra.gmra.mxu1 %v1388_v5 }
 0x1df   :  { %2730 = vmatprep.subr.mxu0 %v3482_v47  ;;  %2750 = vmatprep.subr.mxu1 %v3378_v7 }
 0x1e0   :  { %2731 = vmatpush3.msra.mxu0 %v3482_v47  ;;  %2751 = vmatpush3.msra.mxu1 %v3378_v7 }
 0x1e1   :  { %2732 = vmatprep.subr.mxu0 %v3485_v52  ;;  %2752 = vmatprep.subr.mxu1 %v3405_v13 }
 0x1e2   :  { %2691 = vmatprep.mubr.f32.mxu0 %v3530_v57  ;;  %2713 = vmatprep.mubr.f32.mxu1 %v1398_v32 }
 0x1e3   :  { %2733 = vmatpush3.msra.mxu0 %v3485_v52  ;;  %2753 = vmatpush3.msra.mxu1 %v3405_v13 }
 0x1e4   :  { %2692 = vmatmul.mubr.f32.gmra.mxu0 %v3540_v17  ;;  %2714 = vmatmul.mubr.f32.gmra.mxu1 %v1408_v33 }
 0x1e5   :  { %2734 = vmatprep.subr.mxu0 %v3514_v56  ;;  %2754 = vmatprep.subr.mxu1 %v3372_v54 }
 0x1e6   :  { %2735 = vmatpush3.msra.mxu0 %v3514_v56  ;;  %2755 = vmatpush3.msra.mxu1 %v3372_v54 }
 0x1e7   :  { %2736 = vmatprep.subr.mxu0 %v3524_v41  ;;  %2756 = vmatprep.subr.mxu1 %v3380_v8 }
 0x1e8   :  { %2716 = vmatprep.mubr.f32.mxu1 %v1418_v22  ;;  %2737 = vmatpush3.msra.mxu0 %v3524_v41 }
 0x1e9   :  { %2738 = vmatprep.mubr.f32.mxu0 %v3291_v21  ;;  %2757 = vmatpush3.msra.mxu1 %v3380_v8 }
 0x1ea   :  { %2717 = vmatmul.mubr.f32.gmra.mxu1 %v1428_v26  ;;  %2739 = vmatmul.mubr.f32.vlgmr.msra.gmra.mxu0 %v3370_v42 }
 0x1eb   :  { %2758 = vmatprep.subr.mxu1 %v3441_v48  ;;  %2719 = vmatprep.mubr.f32.mxu1 %v1438_v30 }
 0x1ec   :  { %2759 = vmatpush3.msra.mxu1 %v3441_v48  ;;  %2741 = vmatprep.mubr.f32.mxu0 %v3393_v44  ;;  %v1271_v48 = vpop.permute.xlu0 %1270 }
 0x1ed   :  { %2760 = vmatprep.subr.mxu1 %v3403_v59  ;;  %v1273_v1 = vsel %vm37_vm0, %v3361_v20, %v1271_v48 }
 0x1ee   :  { %2761 = vmatpush3.msra.mxu1 %v3403_v59  ;;  %2742 = vmatmul.mubr.f32.gmra.mxu0 %v3412_v14  ;;  %v1277_v32 = vrot.slane %v1273_v1, %v1268_v46 }
 0x1ef   :  { %2720 = vmatmul.mubr.f32.gmra.mxu1 %v1448_v6  ;;  %2762 = vmatprep.subr.mxu1 %v3478_v16 }
 0x1f0   :  { %2763 = vmatpush3.msra.mxu1 %v3478_v16  ;;  %2744 = vmatprep.mubr.f32.mxu0 %v3436_v60 }
 0x1f1   :  { %2764 = vmatprep.subr.mxu1 %v3447_v49  ;;  %2766 = vmatprep.mubr.f32.mxu1 %v3291_v21 }
 0x1f2   :  { %2765 = vmatpush3.msra.mxu1 %v3447_v49  ;;  %2745 = vmatmul.mubr.f32.gmra.mxu0 %v3458_v18 }
 0x1f3   :  { %2767 = vmatmul.mubr.f32.vlgmr.msra.gmra.mxu1 %v3370_v42  ;;  %2747 = vmatprep.mubr.f32.mxu0 %v3503_v58 }
 0x1f4   :  { %2769 = vmatprep.mubr.f32.mxu1 %v3393_v44 }
 0x1f6   :  { %2748 = vmatmul.mubr.f32.gmra.mxu0 %v3517_v28 }
 0x1f7   :  { %2770 = vmatmul.mubr.f32.gmra.mxu1 %v3412_v14 }
 0x1f8   :  { %2772 = vmatprep.mubr.f32.mxu1 %v3436_v60 }
 0x1fb   :  { %2773 = vmatmul.mubr.f32.gmra.mxu1 %v3458_v18 }
 0x1fc   :  { %2775 = vmatprep.mubr.f32.mxu1 %v3503_v58 }
 0x1ff   :  { %2776 = vmatmul.mubr.f32.gmra.mxu1 %v3517_v28 }
 0x27c   :  { %v2628_v21 = vpop.f32.mrf.mxu0 }
 0x27d   :  { %v1393_v55 = vadd.f32 %v2628_v21, %v1277_v32 }
 0x27e   :  { %v1382_v23 = vpop.f32.mrf.mxu0 }
 0x27f   :  { %v1383_v22 = vadd.f32 %v1382_v23, %v1277_v32 }
 0x281   :  { %v2631_v34 = vpop.f32.mrf.mxu0 }
 0x282   :  { %v1413_v61 = vadd.f32 %v2631_v34, %v1277_v32 }
 0x283   :  { %v1402_v42 = vpop.f32.mrf.mxu0 }
 0x284   :  { %v1403_v46 = vadd.f32 %v1402_v42, %v1277_v32 }
 0x286   :  { %v2634_v54 = vpop.f32.mrf.mxu0  ;;  %v2656_v7 = vpop.f32.mrf.mxu1 }
 0x287   :  { %v1570_v58 = vadd.f32 %v2656_v7, %v1393_v55  ;;  %v1433_v20 = vadd.f32 %v2634_v54, %v1277_v32 }
 0x288   :  { %v1422_v8 = vpop.f32.mrf.mxu0  ;;  %v1563_v53 = vpop.f32.mrf.mxu1 }
 0x289   :  { %v1564_v31 = vadd.f32 %v1563_v53, %v1383_v22  ;;  %v1423_v6 = vadd.f32 %v1422_v8, %v1277_v32 }
 0x28c   :  { %v2637_v44 = vpop.f32.mrf.mxu0  ;;  %v2659_v15 = vpop.f32.mrf.mxu1 }
 0x28d   :  { %v1582_v38 = vadd.f32 %v2659_v15, %v1413_v61  ;;  %v1453_v62 = vadd.f32 %v2637_v44, %v1277_v32 }
 0x28e   :  { %v3666_v59 = vpop.f32.mrf.mxu0  ;;  %v1575_v13 = vpop.f32.mrf.mxu1 }
 0x28f   :  { %v1576_v39 = vadd.f32 %v1575_v13, %v1403_v46  ;;  %v1443_v53 = vadd.f32 %v3666_v59, %v1277_v32 }
 0x292   :  { %v2662_v4 = vpop.f32.mrf.mxu1  ;;  %v2684_v5 = vpop.f32.mrf.mxu0 }
 0x293   :  { %v1701_v41 = vadd.f32 %v2684_v5, %v1570_v58  ;;  %v1594_v11 = vadd.f32 %v2662_v4, %v1433_v20 }
 0x294   :  { %v1587_v14 = vpop.f32.mrf.mxu1  ;;  %v1693_v37 = vpop.f32.mrf.mxu0 }
 0x295   :  { %v1694_v25 = vadd.f32 %v1693_v37, %v1564_v31  ;;  %v1588_v3 = vadd.f32 %v1587_v14, %v1423_v6 }
 0x298   :  { %v2665_v27 = vpop.f32.mrf.mxu1  ;;  %v2687_v36 = vpop.f32.mrf.mxu0 }
 0x299   :  { %v1715_v17 = vadd.f32 %v2687_v36, %v1582_v38  ;;  %v1606_v8 = vadd.f32 %v2665_v27, %v1453_v62 }
 0x29a   :  { %v3668_v60 = vpop.f32.mrf.mxu1  ;;  %v1707_v40 = vpop.f32.mrf.mxu0 }
 0x29b   :  { %v1708_v35 = vadd.f32 %v1707_v40, %v1576_v39  ;;  %v1600_v14 = vadd.f32 %v3668_v60, %v1443_v53 }
 0x29e   :  { %v2690_v0 = vpop.f32.mrf.mxu0  ;;  %v2712_v49 = vpop.f32.mrf.mxu1 }
 0x29f   :  { %v1832_v19 = vadd.f32 %v2712_v49, %v1701_v41  ;;  %v1729_v34 = vadd.f32 %v2690_v0, %v1594_v11 }
 0x2a0   :  { %v1721_v63 = vpop.f32.mrf.mxu0  ;;  %v1823_v18 = vpop.f32.mrf.mxu1 }
 0x2a1   :  { %v1824_v50 = vadd.f32 %v1823_v18, %v1694_v25  ;;  %v1722_v15 = vadd.f32 %v1721_v63, %v1588_v3 }
 0x2a4   :  { %v2693_v29 = vpop.f32.mrf.mxu0  ;;  %v2715_v16 = vpop.f32.mrf.mxu1 }
 0x2a5   :  { %v1848_v10 = vadd.f32 %v2715_v16, %v1715_v17  ;;  %v1743_v40 = vadd.f32 %v2693_v29, %v1606_v8 }
 0x2a6   :  { %v3674_v47 = vpop.f32.mrf.mxu0  ;;  %v1839_v52 = vpop.f32.mrf.mxu1 }
 0x2a7   :  { %v1840_v42 = vadd.f32 %v1839_v52, %v1708_v35  ;;  %v1736_v49 = vadd.f32 %v3674_v47, %v1600_v14 }
 0x2aa   :  { %v2718_v33 = vpop.f32.mrf.mxu1  ;;  %v2740_v24 = vpop.f32.mrf.mxu0 }
 0x2ab   :  { %v1981_v45 = vadd.f32 %v2740_v24, %v1832_v19  ;;  %v1864_v13 = vadd.f32 %v2718_v33, %v1729_v34 }
 0x2ac   :  { %v1855_v56 = vpop.f32.mrf.mxu1  ;;  %v1974_v28 = vpop.f32.mrf.mxu0 }
 0x2ad   :  { %v1975_v2 = vadd.f32 %v1974_v28, %v1824_v50  ;;  %v1856_v27 = vadd.f32 %v1855_v56, %v1722_v15 }
 0x2ae   :  { %v2743_v26 = vpop.f32.mrf.mxu0 }
 0x2af   :  { %v2721_v57 = vpop.f32.mrf.mxu1  ;;  %v1993_v54 = vadd.f32 %v2743_v26, %v1848_v10 }
 0x2b0   :  { %v1986_v12 = vpop.f32.mrf.mxu0  ;;  %v1880_v63 = vadd.f32 %v2721_v57, %v1743_v40 }
 0x2b1   :  { %v1871_v43 = vpop.f32.mrf.mxu1  ;;  %v1987_v4 = vadd.f32 %v1986_v12, %v1840_v42 }
 0x2b2   :  { %v2746_v30 = vpop.f32.mrf.mxu0  ;;  %v1872_v29 = vadd.f32 %v1871_v43, %v1736_v49 }
 0x2b3   :  { %v2768_v51 = vpop.f32.mrf.mxu1  ;;  %v2005_v48 = vadd.f32 %v2746_v30, %v1864_v13 }
 0x2b4   :  { %v2102_v9 = vadd.f32 %v2768_v51, %v1981_v45  ;;  %v1998_v21 = vpop.f32.mrf.mxu0 }
 0x2b5   :  { %v2095_v23 = vpop.f32.mrf.mxu1  ;;  %v1999_v18 = vadd.f32 %v1998_v21, %v1856_v27 }
 0x2b6   :  { %2142 = vst.msk [vmem:[%s3755_s4 + $0x8] sm:$0xff] %vm37_vm0, %v2102_v9  ;;  %v2096_v7 = vadd.f32 %v2095_v23, %v1975_v2  ;;  %2159 = vrot.lane.b32.xlu0 %v2102_v9, %s2781_s19  ;;  %v2749_v37 = vpop.f32.mrf.mxu0 }
 0x2b7   :  { %v2771_v44 = vpop.f32.mrf.mxu1  ;;  %v2017_v16 = vadd.f32 %v2749_v37, %v1880_v63 }
 0x2b8   :  { %2141 = vst.msk [vmem:[%s3755_s4] sm:$0xff] %vm37_vm0, %v2096_v7  ;;  %v2114_v5 = vadd.f32 %v2771_v44, %v1993_v54  ;;  %2157 = vrot.lane.b32.xlu1 %v2096_v7, %s2781_s19  ;;  %v2010_v1 = vpop.f32.mrf.mxu0 }
 0x2b9   :  { %v2107_v36 = vpop.f32.mrf.mxu1  ;;  %v2011_v55 = vadd.f32 %v2010_v1, %v1872_v29 }
 0x2ba   :  { %2144 = vst.msk [vmem:[%s3755_s4 + $0x18] sm:$0xff] %vm37_vm0, %v2114_v5  ;;  %v2108_v59 = vadd.f32 %v2107_v36, %v1987_v4  ;;  %2163 = vrot.lane.b32.xlu0 %v2114_v5, %s2781_s19 }
 0x2bb   :  { %v2774_v0 = vpop.f32.mrf.mxu1 }
 0x2bc   :  { %2143 = vst.msk [vmem:[%s3755_s4 + $0x10] sm:$0xff] %vm37_vm0, %v2108_v59  ;;  %v2126_v60 = vadd.f32 %v2774_v0, %v2005_v48  ;;  %2161 = vrot.lane.b32.xlu1 %v2108_v59, %s2781_s19 }
 0x2bd   :  { %v2119_v32 = vpop.f32.mrf.mxu1 }
 0x2be   :  { %2146 = vst.msk [vmem:[%s3755_s4 + $0x28] sm:$0xff] %vm37_vm0, %v2126_v60  ;;  %v2120_v47 = vadd.f32 %v2119_v32, %v1999_v18  ;;  %2167 = vrot.lane.b32.xlu0 %v2126_v60, %s2781_s19 }
 0x2bf   :  { %v2777_v52 = vpop.f32.mrf.mxu1 }
 0x2c0   :  { %2145 = vst.msk [vmem:[%s3755_s4 + $0x20] sm:$0xff] %vm37_vm0, %v2120_v47  ;;  %v2138_v33 = vadd.f32 %v2777_v52, %v2017_v16  ;;  %2165 = vrot.lane.b32.xlu1 %v2120_v47, %s2781_s19 }
 0x2c1   :  { %v2131_v24 = vpop.f32.mrf.mxu1 }
 0x2c2   :  { %2148 = vst.msk [vmem:[%s3755_s4 + $0x38] sm:$0xff] %vm37_vm0, %v2138_v33  ;;  %v2132_v61 = vadd.f32 %v2131_v24, %v2011_v55  ;;  %2171 = vrot.lane.b32.xlu0 %v2138_v33, %s2781_s19 }
 0x2c4   :  { %2147 = vst.msk [vmem:[%s3755_s4 + $0x30] sm:$0xff] %vm37_vm0, %v2132_v61  ;;  %2169 = vrot.lane.b32.xlu1 %v2132_v61, %s2781_s19 }
 0x328   :  { %v2160_v58 = vpop.permute.xlu0 %2159 }
 0x329   :  { %2195 = vst.msk [vmem:[%s3755_s4 + $0x48] sm:$0xff] %vm37_vm0, %v2160_v58 }
 0x32a   :  { %v2158_v22 = vpop.permute.xlu1 %2157 }
 0x32b   :  { %2194 = vst.msk [vmem:[%s3755_s4 + $0x40] sm:$0xff] %vm37_vm0, %v2158_v22 }
 0x32c   :  { %v2164_v56 = vpop.permute.xlu0 %2163 }
 0x32d   :  { %2197 = vst.msk [vmem:[%s3755_s4 + $0x58] sm:$0xff] %vm37_vm0, %v2164_v56 }
 0x32e   :  { %v2162_v28 = vpop.permute.xlu1 %2161 }
 0x32f   :  { %2196 = vst.msk [vmem:[%s3755_s4 + $0x50] sm:$0xff] %vm37_vm0, %v2162_v28 }
 0x330   :  { %v2168_v41 = vpop.permute.xlu0 %2167 }
 0x331   :  { %2199 = vst.msk [vmem:[%s3755_s4 + $0x68] sm:$0xff] %vm37_vm0, %v2168_v41 }
 0x332   :  { %v2166_v31 = vpop.permute.xlu1 %2165 }
 0x333   :  { %2198 = vst.msk [vmem:[%s3755_s4 + $0x60] sm:$0xff] %vm37_vm0, %v2166_v31 }
 0x334   :  { %v2172_v26 = vpop.permute.xlu0 %2171 }
 0x335   :  { %2201 = vst.msk [vmem:[%s3755_s4 + $0x78] sm:$0xff] %vm37_vm0, %v2172_v26 }
 0x336   :  { %v2170_v20 = vpop.permute.xlu1 %2169 }
 0x337   :  { %2200 = vst.msk [vmem:[%s3755_s4 + $0x70] sm:$0xff] %vm37_vm0, %v2170_v20 }

</bundles_post_ra>
